<compile_context>
chip_gen: v7x
topology: tpu7x:2x2x1
jax: 0.10.0
libtpu: 0.0.40
codegen_flags: <defaults>
</compile_context>

<pallas_src>
import functools
from typing import NamedTuple

import numpy as np
import jax
import jax.numpy as jnp
from jax.experimental import pallas as pl
from jax.experimental.pallas import tpu as pltpu


def _round_up(v, m):
    return (v + m - 1) // m * m


class GDeconvSpec(NamedTuple):
    kwidth: int
    stride: int
    cin: int
    cout: int
    pad: int
    q_max: int      # largest input-row shift used by any tap
    g: int          # output super-rows packed per kernel output row
    n_shift: int    # g + nq - 1 shifted input copies per packed row
    kdim: int       # padded contraction width (n_shift*cin rounded up to 8)
    n_lanes: int    # kernel output lane width (multiple of 128, lane-dense)


def gdeconv1d_mm_kernel(x_ref, w_ref, b_ref, a_ref, o_ref):
    """One fused MXU matmul (phase/shift-grouped, lane-packed deconv taps) + bias + PReLU.

    x_ref: (tm, kdim)       bf16; rows = (batch, packed output row); cols = shifted x copies
    w_ref: (kdim, n_lanes)  bf16; phase/shift-grouped taps, lane-dense
    b_ref: (1, n_lanes)     f32;  bias tiled per packed output position
    a_ref: (1, n_lanes)     f32;  PReLU alpha tiled per packed output position
    o_ref: (tm, n_lanes)    model dtype; lane-dense, unmasked stores
    """
    h = jnp.dot(x_ref[...], w_ref[...], preferred_element_type=jnp.float32)
    h = h + b_ref[...]                       # bias on the VPU (free slots; kernel is store-bound)
    h = jnp.where(h > 0, h, a_ref[...] * h)  # per-channel PReLU
    o_ref[...] = h.astype(o_ref.dtype)


def prepare_gdeconv1d_params(weight, bias, alpha, *, kwidth, stride):
    """Build the parameter-only slabs once (hoisted out of the per-call hot path).

    weight: (Cin, Cout, K) in PyTorch ConvTranspose1d layout; bias/alpha: (Cout,).
    Returns ((w_aug, b_slab, a_slab), spec).
    """
    cin, cout, k_ = weight.shape
    assert k_ == kwidth
    pad = max(0, (stride - kwidth) // -2)
    q_min = (0 - pad) // stride
    q_max = (kwidth - 1 - pad) // stride
    nq = q_max - q_min + 1

    w_out = stride * cout
    # Lane-dense packing factor: pack g super-rows so g*stride*cout fills the 128-lane vreg.
    g = 128 // w_out if (w_out < 128 and 128 % w_out == 0) else 1
    n_lanes = _round_up(g * w_out, 128)

    s_min = -q_max
    n_shift = g + nq - 1                       # shifted x copies per packed output row
    kdim_raw = n_shift * cin
    kdim = _round_up(kdim_raw, 8)

    # Static tap table: tap k feeding (shift s, packed offset u, phase r); index kwidth -> zeros.
    tap_idx = np.full((n_shift, g, stride), kwidth, dtype=np.int32)
    for si in range(n_shift):
        s = s_min + si
        for u in range(g):
            for r in range(stride):
                k = (u - s) * stride + r + pad
                if 0 <= k < kwidth:
                    tap_idx[si, u, r] = k

    # Single gather instead of a K-iteration scatter loop.
    w_ext = jnp.concatenate(
        [jnp.moveaxis(weight.astype(jnp.float32), 2, 0),            # (K, Cin, Cout)
         jnp.zeros((1, cin, cout), jnp.float32)], axis=0)
    w_sel = w_ext[tap_idx]                                          # (n_shift, g, stride, Cin, Cout)
    w_aug = jnp.transpose(w_sel, (0, 3, 1, 2, 4)).reshape(kdim_raw, g * w_out)
    w_aug = jnp.pad(w_aug, ((0, kdim - kdim_raw),
                            (0, n_lanes - g * w_out))).astype(jnp.bfloat16)

    b_slab = jnp.pad(jnp.tile(bias.astype(jnp.float32), g * stride)[None, :],
                     ((0, 0), (0, n_lanes - g * w_out)))
    a_slab = jnp.pad(jnp.tile(alpha.astype(jnp.float32), g * stride)[None, :],
                     ((0, 0), (0, n_lanes - g * w_out)))

    spec = GDeconvSpec(kwidth=kwidth, stride=stride, cin=cin, cout=cout, pad=pad,
                       q_max=q_max, g=g, n_shift=n_shift, kdim=kdim, n_lanes=n_lanes)
    return (w_aug, b_slab, a_slab), spec


@functools.partial(jax.jit, static_argnames=("spec",))
def gdeconv1d_block(x_ncl, w_aug, b_slab, a_slab, *, spec):
    """GDeconv1DBlock forward: x (N, Cin, Lin) -> (N, Cout, Lout) (PyTorch NCL layouts)."""
    n, cin, lin = x_ncl.shape
    assert cin == spec.cin
    stride, kwidth, pad, g = spec.stride, spec.kwidth, spec.pad, spec.g
    cout, n_shift, kdim, n_lanes = spec.cout, spec.n_shift, spec.kdim, spec.n_lanes

    lout_full = (lin - 1) * stride - 2 * pad + kwidth
    lout = lout_full - 1 if (kwidth % 2 != 0) else lout_full   # h = h[:, :, :-1] for odd kwidth
    sup = g * stride                                           # output positions per packed row
    m_sup = -(-lout // sup)                                    # packed rows per batch element

    # ---- LHS: (N*m_sup, n_shift*Cin) — n_shift shifted copies of x built from ONE zero-padded
    #      x so the tap halo is shared across the g positions packed into each row (zero-FLOP
    #      layout plumbing).  TODO(synk): for very long Lin this could be assembled in-kernel
    #      from a halo'd row block to avoid the residual ~(g+nq-1)/g x input duplication in HBM.
    x_nlc = jnp.transpose(x_ncl, (0, 2, 1))                    # (N, Lin, Cin)
    left = spec.q_max
    need = (m_sup - 1) * g + n_shift
    right = max(0, need - left - lin)
    xp = jnp.pad(x_nlc, ((0, 0), (left, right), (0, 0)))
    shifted = [xp[:, si:si + m_sup * g:g, :] for si in range(n_shift)]   # each (N, m_sup, Cin)
    x_aug = jnp.concatenate(shifted, axis=-1).reshape(n * m_sup, n_shift * cin)
    x_aug = x_aug.astype(jnp.bfloat16)

    # ---- Row tiling: tm <= 512 (VMEM-safe on v7x's 64 MiB); >=2 grid steps once the problem is
    #      big enough to be worth splitting across v7x's two TensorCores. ----
    rows = n * m_sup
    if rows > 512:
        tm = 512
    elif rows > 64:
        tm = _round_up(-(-rows // 2), 8)
    else:
        tm = _round_up(rows, 8)
    m_total = _round_up(rows, tm)
    x_aug = jnp.pad(x_aug, ((0, m_total - rows), (0, kdim - n_shift * cin)))

    out_dtype = x_ncl.dtype
    cost = pl.CostEstimate(
        flops=2 * m_total * kdim * n_lanes,
        transcendentals=0,
        bytes_accessed=(m_total * kdim + kdim * n_lanes) * 2 + 2 * n_lanes * 4
                       + m_total * n_lanes * jnp.dtype(out_dtype).itemsize)

    out_slab = pl.pallas_call(
        gdeconv1d_mm_kernel,
        out_shape=jax.ShapeDtypeStruct((m_total, n_lanes), out_dtype),
        grid_spec=pltpu.PrefetchScalarGridSpec(
            num_scalar_prefetch=0,
            grid=(m_total // tm,),
            in_specs=[
                pl.BlockSpec((tm, kdim), lambda i: (i, 0)),
                pl.BlockSpec((kdim, n_lanes), lambda i: (0, 0)),   # grid-invariant weights
                pl.BlockSpec((1, n_lanes), lambda i: (0, 0)),      # grid-invariant bias
                pl.BlockSpec((1, n_lanes), lambda i: (0, 0)),      # grid-invariant alpha
            ],
            out_specs=pl.BlockSpec((tm, n_lanes), lambda i: (i, 0)),
        ),
        compiler_params=pltpu.CompilerParams(dimension_semantics=("parallel",)),
        cost_estimate=cost,
    )(x_aug, w_aug, b_slab, a_slab)

    # ---- Un-interleave (layout plumbing): (rows, n_lanes) -> (N, Lout, Cout) -> NCL.
    #      TODO(synk): skip the final transpose if the downstream consumer accepts NLC. ----
    y = out_slab[:rows].reshape(n, m_sup, n_lanes)[:, :, :g * stride * cout]
    y = y.reshape(n, m_sup * sup, cout)[:, :lout, :]
    return jnp.transpose(y, (0, 2, 1))


def ref_gdeconv1d_block(x, w, b, alpha, kwidth, stride):
    """NumPy reference matching PyTorch ConvTranspose1d + odd-trim + PReLU."""
    n, cin, lin = x.shape
    cout = w.shape[1]
    pad = max(0, (stride - kwidth) // -2)
    lfull = (lin - 1) * stride + kwidth
    y = np.zeros((n, cout, lfull), dtype=np.float64)
    for l in range(lin):
        for k in range(kwidth):
            y[:, :, l * stride + k] += np.einsum("nc,cd->nd", x[:, :, l], w[:, :, k])
    y = y[:, :, pad:lfull - pad] if pad > 0 else y
    y = y + b[None, :, None]
    if kwidth % 2 != 0:
        y = y[:, :, :-1]
    return np.where(y > 0, y, alpha[None, :, None] * y)


if __name__ == "__main__":
    # Module config: GDeconv1DBlock(ninp=4, fmaps=8, kwidth=8, stride=4, norm_type=None, act=None)
    ninp, fmaps, kwidth, stride = 4, 8, 8, 4
    N, Lin = 2, 16

    key = jax.random.PRNGKey(0)
    kx, kw_, kb, ka = jax.random.split(key, 4)
    x = jax.random.normal(kx, (N, ninp, Lin), dtype=jnp.float32)           # PyTorch NCL input
    weight = 0.1 * jax.random.normal(kw_, (ninp, fmaps, kwidth), dtype=jnp.float32)
    bias = 0.1 * jax.random.normal(kb, (fmaps,), dtype=jnp.float32)
    # PReLU(fmaps, init=0) would be all-zero slopes; use nonzero to exercise the full PReLU path.
    alpha = 0.25 * jax.random.normal(ka, (fmaps,), dtype=jnp.float32)

    params, spec = prepare_gdeconv1d_params(weight, bias, alpha, kwidth=kwidth, stride=stride)
    out = gdeconv1d_block(x, *params, spec=spec)
    out = jax.block_until_ready(out)

    # Reference uses the same bf16 operand rounding the kernel uses (accumulation stays f32/f64).
    x_bf = np.asarray(x.astype(jnp.bfloat16).astype(jnp.float32), dtype=np.float64)
    w_bf = np.asarray(weight.astype(jnp.bfloat16).astype(jnp.float32), dtype=np.float64)
    ref = ref_gdeconv1d_block(x_bf, w_bf, np.asarray(bias, np.float64),
                              np.asarray(alpha, np.float64), kwidth, stride)
    assert out.shape == ref.shape, (out.shape, ref.shape)
    np.testing.assert_allclose(np.asarray(out, np.float64), ref, rtol=2e-3, atol=2e-3)

    print("KERNEL_OK")
</pallas_src>

<mosaic_0001>
module attributes {stable_mosaic.version = 11 : i64} {
  func.func @gdeconv1d_mm_kernel(%arg0: i32, %arg1: memref<8x24xbf16, #tpu.memory_space<vmem>>, %arg2: memref<24x128xbf16, #tpu.memory_space<vmem>>, %arg3: memref<1x128xf32, #tpu.memory_space<vmem>>, %arg4: memref<1x128xf32, #tpu.memory_space<vmem>>, %arg5: memref<8x128xf32, #tpu.memory_space<vmem>>) attributes {dimension_semantics = [#tpu.dimension_semantics<parallel>], iteration_bounds = array<i64: 1>, scalar_prefetch = 0 : i64, scratch_operands = 0 : i64, tpu.core_type = #tpu.core_type<tc>, window_params = [{transform_indices = @transform_0, window_bounds = array<i64: 8, 24>}, {pipeline_mode = #tpu.pipeline_mode<synchronous>, transform_indices = @transform_1, window_bounds = array<i64: 24, 128>}, {pipeline_mode = #tpu.pipeline_mode<synchronous>, transform_indices = @transform_2, window_bounds = array<i64: 1, 128>}, {pipeline_mode = #tpu.pipeline_mode<synchronous>, transform_indices = @transform_3, window_bounds = array<i64: 1, 128>}, {transform_indices = @transform_4, window_bounds = array<i64: 8, 128>}]} {
    %c0 = arith.constant 0 : index
    %c0_0 = arith.constant 0 : index
    %0 = vector.load %arg1[%c0, %c0_0] : memref<8x24xbf16, #tpu.memory_space<vmem>>, vector<8x24xbf16>
    %c0_1 = arith.constant 0 : index
    %c0_2 = arith.constant 0 : index
    %1 = vector.load %arg2[%c0_1, %c0_2] : memref<24x128xbf16, #tpu.memory_space<vmem>>, vector<24x128xbf16>
    %cst = arith.constant dense<0.000000e+00> : vector<8x128xf32>
    %2 = tpu.matmul %0, %1, %cst {dimension_numbers = #tpu.dot_dimension_numbers<[1], [0], [0], [1], [0, 0, 1, 1], [], []>} : vector<8x24xbf16>, vector<24x128xbf16>, vector<8x128xf32> -> vector<8x128xf32>
    %c0_3 = arith.constant 0 : index
    %c0_4 = arith.constant 0 : index
    %3 = vector.load %arg3[%c0_3, %c0_4] : memref<1x128xf32, #tpu.memory_space<vmem>>, vector<1x128xf32>
    %4 = vector.broadcast %3 : vector<1x128xf32> to vector<8x128xf32>
    %5 = arith.addf %2, %4 : vector<8x128xf32>
    %cst_5 = arith.constant 0.000000e+00 : f32
    %6 = vector.broadcast %cst_5 : f32 to vector<8x128xf32>
    %7 = arith.cmpf ogt, %5, %6 : vector<8x128xf32>
    %c0_6 = arith.constant 0 : index
    %c0_7 = arith.constant 0 : index
    %8 = vector.load %arg4[%c0_6, %c0_7] : memref<1x128xf32, #tpu.memory_space<vmem>>, vector<1x128xf32>
    %9 = vector.broadcast %8 : vector<1x128xf32> to vector<8x128xf32>
    %10 = arith.mulf %9, %5 : vector<8x128xf32>
    %11 = arith.select %7, %5, %10 : vector<8x128xi1>, vector<8x128xf32>
    %c0_8 = arith.constant 0 : index
    %c0_9 = arith.constant 0 : index
    %12 = vector.load %arg5[%c0_8, %c0_9] : memref<8x128xf32, #tpu.memory_space<vmem>>, vector<8x128xf32>
    tpu.vector_store %arg5[%c0_8, %c0_9], %11 {strides = array<i32>} : memref<8x128xf32, #tpu.memory_space<vmem>>, vector<8x128xf32>,
    return
  }
  func.func @transform_0(%arg0: i32) -> (i32, i32) {
    %c0_i32 = arith.constant 0 : i32
    %c0_i32_0 = arith.constant 0 : i32
    return %arg0, %c0_i32 : i32, i32
  }
  func.func @transform_1(%arg0: i32) -> (i32, i32) {
    %c0_i32 = arith.constant 0 : i32
    %c0_i32_0 = arith.constant 0 : i32
    %c0_i32_1 = arith.constant 0 : i32
    return %c0_i32, %c0_i32_0 : i32, i32
  }
  func.func @transform_2(%arg0: i32) -> (i32, i32) {
    %c0_i32 = arith.constant 0 : i32
    %c0_i32_0 = arith.constant 0 : i32
    %c0_i32_1 = arith.constant 0 : i32
    return %c0_i32, %c0_i32_0 : i32, i32
  }
  func.func @transform_3(%arg0: i32) -> (i32, i32) {
    %c0_i32 = arith.constant 0 : i32
    %c0_i32_0 = arith.constant 0 : i32
    %c0_i32_1 = arith.constant 0 : i32
    return %c0_i32, %c0_i32_0 : i32, i32
  }
  func.func @transform_4(%arg0: i32) -> (i32, i32) {
    %c0_i32 = arith.constant 0 : i32
    %c0_i32_0 = arith.constant 0 : i32
    return %arg0, %c0_i32 : i32, i32
  }
}

</mosaic_0001>

<bundles_post_ra>
// kernel: gdeconv1d_block.1
= control target key start
LH: loop header
LB: loop body
LE: loop exit
PB: predicated region body
PF: predicated region fallthrough
CT: control target
= control target key end

     0   :  { %v121_v0 = vmov 0.0   ;;  %vm42_vm0 = vcmask 1043456   ;;  %vm122_vm1 = vmmov 0   ;;  %vm38_vm2 = vcmask 195584   ;;  %s166_s1 = inlined_call_operand.vmem [shape: bf16[24,128], index: 1, kind: input, shape index: {}]   ;;  %s167_s0 = inlined_call_operand.vmem [shape: bf16[8,24], index: 0, kind: input, shape index: {}]   ;;  %s168_s2 = inlined_call_operand.vmem [shape: f32[1,128], index: 2, kind: input, shape index: {}]   ;;  %s169_s3 = inlined_call_operand.vmem [shape: f32[1,128], index: 3, kind: input, shape index: {}]   ;;  %s170_s4 = inlined_call_operand.vmem [shape: f32[8,128], index: 4, kind: output, shape index: {}]  }
   0x1   :  { %109 = vmatprep.subr.bf16.mxu0 %v121_v0  ;;  %v119_v1 = vld [vmem:[%s166_s1] sm:$0xff]   ;;  %113 = vmatprep.mubr.msk.bf16.mxu0 %vm122_vm1, %v121_v0  ;;  %v120_v2 = vld [vmem:[%s166_s1 + $0x8] ss:$0 sps:$4 sm:$0xff]  }
   0x2   :  { %110 = vmatpush3.bf16.msra.mxu0 %v119_v1  ;;  %v44_v3 = vsel %vm42_vm0, %v120_v2, 0  ;;  %v18_v4 = vld [vmem:[%s167_s0] sm:$0xf] }
   0x3   :  { %111 = vmatprep.subr.bf16.mxu0 %v121_v0  ;;  %v101_v5 = vld [vmem:[%s168_s2] ss:$0 sm:$0xff] }
   0x4   :  { %v105_v7 = vld [vmem:[%s169_s3] ss:$0 sm:$0xff] }
   0x6   :  { %112 = vmatpush3.bf16.msra.mxu0 %v44_v3 }
   0x9   :  { %114 = vmatmul.mubr.msk.bf16.vlgmr.msra.gmra.mrb[0].mxu0 %vm38_vm2, %v18_v4 }
  0xdc   :  { %v80_v6 = vpop.f32.mrb[0].mxu0 }
  0xdd   :  { %v81_v8 = vadd.f32 %v101_v5, %v80_v6  ;;  %v115_v9 = vpop.f32.mrb[1].mxu0 }
  0xde   :  { %v83_v10 = vpop.f32.mrb[2].mxu0 }
  0xdf   :  { %vm86_vm3 = vcmp.gt.f32.partialorder %v81_v8, 0.0  ;;  %v94_v11 = vmul.f32 %v105_v7, %v81_v8  ;;  %v116_v12 = vpop.f32.mrb[3].mxu0 }
  0xe1   :  { %v95_v13 = vsel %vm86_vm3, %v81_v8, %v94_v11 }
  0xe2   :  { %96 = vst [vmem:[%s170_s4] sm:$0xff] %v95_v13 }

</bundles_post_ra>
